<compile_context>
chip_gen: v7x
topology: tpu7x:2x2x1
jax: 0.10.0
libtpu: 0.0.40
codegen_flags: <defaults>
</compile_context>

<pallas_src>
import functools

import jax
import jax.numpy as jnp
from jax import lax
from jax.experimental import pallas as pl
from jax.experimental.pallas import tpu as pltpu


# ---------------------------------------------------------------------------
# Fused kernel: expand 1x1 -> BN -> ReLU6 -> dw 3x3 -> BN -> ReLU6 ->
#               project 1x1 -> BN -> residual add, for one batch element.
# Layout inside the kernel: (channels, H*W)  -- H*W on the lane axis.
# ---------------------------------------------------------------------------
def _fused_block_kernel(x_ref, w1_ref, s1_ref, b1_ref,
                        wd_ref, s2_ref, b2_ref,
                        w3_ref, s3_ref, b3_ref,
                        mask_ref, o_ref, *, H, W):
    HW = H * W
    x = x_ref[0]                                                  # (Cin, HW)

    # ---- expansion 1x1 conv (channel matmul) + folded BN + ReLU6 ----------
    h1 = jnp.dot(w1_ref[...], x, preferred_element_type=jnp.float32)  # (Chid, HW)
    h1 = jnp.clip(h1 * s1_ref[...] + b1_ref[...], 0.0, 6.0)

    # ---- depthwise 3x3 (stride 1, pad 1) + folded BN + ReLU6 --------------
    # Each spatial tap (dy, dx) is a lane rotation of the flattened H*W axis
    # by dy*W + dx (goes to the XLU, overlapping the VALU MACs).  Positions
    # whose source pixel falls outside the image are zeroed by a precomputed
    # per-tap mask, which also kills the rotation wrap-around values.
    acc = jnp.zeros_like(h1)
    k = 0
    for dy in (-1, 0, 1):
        for dx in (-1, 0, 1):
            s = dy * W + dx
            tap = wd_ref[:, k:k + 1]                              # (Chid, 1)
            if s == 0:
                acc = acc + h1 * tap                              # center tap, no mask
            else:
                shifted = pltpu.roll(h1, (-s) % HW, 1)            # shifted[p] = h1[p + s]
                acc = acc + shifted * tap * mask_ref[k:k + 1, :]
            k += 1
    h2 = jnp.clip(acc * s2_ref[...] + b2_ref[...], 0.0, 6.0)

    # ---- projection 1x1 conv + folded BN + residual add -------------------
    y = jnp.dot(w3_ref[...], h2, preferred_element_type=jnp.float32)  # (Cout, HW)
    y = y * s3_ref[...] + b3_ref[...]
    o_ref[0] = (x + y).astype(o_ref.dtype)


# ---------------------------------------------------------------------------
# Host-side helpers
# ---------------------------------------------------------------------------
def _tap_masks(H, W):
    """(9, H*W) float masks: 1.0 where the (dy,dx) source pixel is in-bounds."""
    hw = jnp.arange(H * W, dtype=jnp.int32)
    row = hw // W
    col = hw % W
    masks = []
    for dy in (-1, 0, 1):
        for dx in (-1, 0, 1):
            ok = ((row + dy >= 0) & (row + dy < H) &
                  (col + dx >= 0) & (col + dx < W))
            masks.append(ok.astype(jnp.float32))
    return jnp.stack(masks, axis=0)


@functools.partial(jax.jit, static_argnames=("stride",))
def mobilenet_v2_block(x_nchw, params, *, stride):
    N, Cin, H, W = x_nchw.shape
    Chid = params["w1"].shape[0]
    Cout = params["w3"].shape[0]
    res_connection = (stride == 1 and Cin == Cout)
    if not res_connection:
        # Faithful to the PyTorch forward(): when there is no residual
        # connection the module returns the *input* unchanged (out = x), so
        # the conv stack never affects the output.
        # TODO(synk): stride>1 depthwise path is unreachable in the reference
        # forward (output never depends on it), so it is not implemented.
        return x_nchw

    HW = H * W
    x3 = x_nchw.reshape(N, Cin, HW)        # contiguity-preserving, no transpose
    masks = _tap_masks(H, W)

    flops = int(N * HW * (2 * Cin * Chid + 4 * 9 * Chid + 2 * Chid * Cout
                          + 6 * Chid + 3 * Cout))
    bytes_accessed = int(4 * (N * Cin * HW + N * Cout * HW + 9 * HW
                              + Chid * (Cin + 9 + 4) + Cout * (Chid + 2)))

    kernel = functools.partial(_fused_block_kernel, H=H, W=W)
    bcast2 = lambda n: (0, 0)
    out = pl.pallas_call(
        kernel,
        out_shape=jax.ShapeDtypeStruct((N, Cout, HW), jnp.float32),
        grid=(N,),
        in_specs=[
            pl.BlockSpec((1, Cin, HW), lambda n: (n, 0, 0)),   # x (per image)
            pl.BlockSpec((Chid, Cin), bcast2),                 # w1
            pl.BlockSpec((Chid, 1), bcast2),                   # s1
            pl.BlockSpec((Chid, 1), bcast2),                   # b1
            pl.BlockSpec((Chid, 9), bcast2),                   # wd (3x3 taps)
            pl.BlockSpec((Chid, 1), bcast2),                   # s2
            pl.BlockSpec((Chid, 1), bcast2),                   # b2
            pl.BlockSpec((Cout, Chid), bcast2),                # w3
            pl.BlockSpec((Cout, 1), bcast2),                   # s3
            pl.BlockSpec((Cout, 1), bcast2),                   # b3
            pl.BlockSpec((9, HW), bcast2),                     # boundary masks
        ],
        out_specs=pl.BlockSpec((1, Cout, HW), lambda n: (n, 0, 0)),
        compiler_params=pltpu.CompilerParams(
            dimension_semantics=("parallel",)),
        cost_estimate=pl.CostEstimate(
            flops=flops, transcendentals=0, bytes_accessed=bytes_accessed),
    )(x3, params["w1"], params["s1"], params["b1"],
      params["wd"], params["s2"], params["b2"],
      params["w3"], params["s3"], params["b3"], masks)
    return out.reshape(N, Cout, H, W)


# ---------------------------------------------------------------------------
# Deterministic parameter construction (synthetic; no checkpoint load)
# ---------------------------------------------------------------------------
def init_params(key, inc, outc, expand_ratio, eps=1e-5):
    hid = inc * expand_ratio
    ks = jax.random.split(key, 15)

    def folded_bn(kg, kb, km, kv, c):
        gamma = 1.0 + 0.1 * jax.random.normal(kg, (c,), jnp.float32)
        beta = 0.1 * jax.random.normal(kb, (c,), jnp.float32)
        mean = 0.1 * jax.random.normal(km, (c,), jnp.float32)
        var = 0.5 + jnp.abs(jax.random.normal(kv, (c,), jnp.float32))
        scale = gamma / jnp.sqrt(var + eps)
        bias = beta - mean * scale
        return scale.reshape(c, 1), bias.reshape(c, 1)

    w1 = 0.3 * jax.random.normal(ks[0], (hid, inc), jnp.float32)    # 1x1 expand (O, I)
    wd = 0.3 * jax.random.normal(ks[1], (hid, 9), jnp.float32)      # depthwise 3x3 taps
    w3 = 0.3 * jax.random.normal(ks[2], (outc, hid), jnp.float32)   # 1x1 project (O, I)
    s1, b1 = folded_bn(ks[3], ks[4], ks[5], ks[6], hid)
    s2, b2 = folded_bn(ks[7], ks[8], ks[9], ks[10], hid)
    s3, b3 = folded_bn(ks[11], ks[12], ks[13], ks[14], outc)
    return {
        "w1": w1, "s1": s1, "b1": b1,
        "wd": wd, "s2": s2, "b2": b2,
        "w3": w3, "s3": s3, "b3": b3,
    }


# ---------------------------------------------------------------------------
# Pure-JAX reference (NCHW, lax.conv) for validation
# ---------------------------------------------------------------------------
def reference(x_nchw, params):
    inc = x_nchw.shape[1]
    hid = params["w1"].shape[0]
    outc = params["w3"].shape[0]
    w1 = params["w1"].reshape(hid, inc, 1, 1)
    wd = params["wd"].reshape(hid, 1, 3, 3)
    w3 = params["w3"].reshape(outc, hid, 1, 1)
    dn = ("NCHW", "OIHW", "NCHW")

    def bn(y, s, b):
        return y * s.reshape(1, -1, 1, 1) + b.reshape(1, -1, 1, 1)

    h = lax.conv_general_dilated(x_nchw, w1, (1, 1), "VALID", dimension_numbers=dn)
    h = jnp.clip(bn(h, params["s1"], params["b1"]), 0.0, 6.0)
    h = lax.conv_general_dilated(h, wd, (1, 1), ((1, 1), (1, 1)),
                                 dimension_numbers=dn, feature_group_count=hid)
    h = jnp.clip(bn(h, params["s2"], params["b2"]), 0.0, 6.0)
    h = lax.conv_general_dilated(h, w3, (1, 1), "VALID", dimension_numbers=dn)
    h = bn(h, params["s3"], params["b3"])
    return x_nchw + h


if __name__ == "__main__":
    key = jax.random.PRNGKey(0)
    k_x, k_p = jax.random.split(key)

    # Residual-connection configuration (stride=1, inc==outc) so the conv
    # stack actually contributes to the output.
    N, inc, H, W = 2, 4, 16, 16
    outc, stride, expand_ratio = 4, 1, 4

    x = jax.random.normal(k_x, (N, inc, H, W), jnp.float32)
    params = init_params(k_p, inc, outc, expand_ratio)

    out = mobilenet_v2_block(x, params, stride=stride)
    out = jax.block_until_ready(out)

    ref = reference(x, params)
    assert out.shape == (N, outc, H, W), out.shape
    max_err = float(jnp.max(jnp.abs(out - ref)))
    assert jnp.allclose(out, ref, atol=1e-2, rtol=1e-2), f"max_err={max_err}"

    print("KERNEL_OK")
</pallas_src>

<mosaic_0001>
module attributes {stable_mosaic.version = 11 : i64} {
  func.func @_fused_block_kernel(%arg0: i32, %arg1: memref<1x4x256xf32, #tpu.memory_space<vmem>>, %arg2: memref<16x4xf32, #tpu.memory_space<vmem>>, %arg3: memref<16x1xf32, #tpu.memory_space<vmem>>, %arg4: memref<16x1xf32, #tpu.memory_space<vmem>>, %arg5: memref<16x9xf32, #tpu.memory_space<vmem>>, %arg6: memref<16x1xf32, #tpu.memory_space<vmem>>, %arg7: memref<16x1xf32, #tpu.memory_space<vmem>>, %arg8: memref<4x16xf32, #tpu.memory_space<vmem>>, %arg9: memref<4x1xf32, #tpu.memory_space<vmem>>, %arg10: memref<4x1xf32, #tpu.memory_space<vmem>>, %arg11: memref<9x256xf32, #tpu.memory_space<vmem>>, %arg12: memref<1x4x256xf32, #tpu.memory_space<vmem>>) attributes {dimension_semantics = [#tpu.dimension_semantics<parallel>], iteration_bounds = array<i64: 2>, scalar_prefetch = 0 : i64, scratch_operands = 0 : i64, tpu.core_type = #tpu.core_type<tc>, window_params = [{transform_indices = @transform_0, window_bounds = array<i64: 1, 4, 256>}, {pipeline_mode = #tpu.pipeline_mode<synchronous>, transform_indices = @transform_1, window_bounds = array<i64: 16, 4>}, {pipeline_mode = #tpu.pipeline_mode<synchronous>, transform_indices = @transform_2, window_bounds = array<i64: 16, 1>}, {pipeline_mode = #tpu.pipeline_mode<synchronous>, transform_indices = @transform_3, window_bounds = array<i64: 16, 1>}, {pipeline_mode = #tpu.pipeline_mode<synchronous>, transform_indices = @transform_4, window_bounds = array<i64: 16, 9>}, {pipeline_mode = #tpu.pipeline_mode<synchronous>, transform_indices = @transform_5, window_bounds = array<i64: 16, 1>}, {pipeline_mode = #tpu.pipeline_mode<synchronous>, transform_indices = @transform_6, window_bounds = array<i64: 16, 1>}, {pipeline_mode = #tpu.pipeline_mode<synchronous>, transform_indices = @transform_7, window_bounds = array<i64: 4, 16>}, {pipeline_mode = #tpu.pipeline_mode<synchronous>, transform_indices = @transform_8, window_bounds = array<i64: 4, 1>}, {pipeline_mode = #tpu.pipeline_mode<synchronous>, transform_indices = @transform_9, window_bounds = array<i64: 4, 1>}, {pipeline_mode = #tpu.pipeline_mode<synchronous>, transform_indices = @transform_10, window_bounds = array<i64: 9, 256>}, {transform_indices = @transform_11, window_bounds = array<i64: 1, 4, 256>}]} {
    %c0 = arith.constant 0 : index
    %c0_0 = arith.constant 0 : index
    %c0_1 = arith.constant 0 : index
    %0 = vector.load %arg1[%c0, %c0_0, %c0_1] : memref<1x4x256xf32, #tpu.memory_space<vmem>>, vector<1x4x256xf32>
    %1 = vector.shape_cast %0 : vector<1x4x256xf32> to vector<4x256xf32>
    %c0_2 = arith.constant 0 : index
    %c0_3 = arith.constant 0 : index
    %2 = vector.load %arg2[%c0_2, %c0_3] : memref<16x4xf32, #tpu.memory_space<vmem>>, vector<16x4xf32>
    %cst = arith.constant dense<0.000000e+00> : vector<16x256xf32>
    %3 = tpu.matmul %2, %1, %cst {dimension_numbers = #tpu.dot_dimension_numbers<[1], [0], [0], [1], [0, 0, 1, 1], [], []>} : vector<16x4xf32>, vector<4x256xf32>, vector<16x256xf32> -> vector<16x256xf32>
    %c0_4 = arith.constant 0 : index
    %c0_5 = arith.constant 0 : index
    %4 = vector.load %arg3[%c0_4, %c0_5] : memref<16x1xf32, #tpu.memory_space<vmem>>, vector<16x1xf32>
    %5 = vector.broadcast %4 : vector<16x1xf32> to vector<16x256xf32>
    %6 = arith.mulf %3, %5 : vector<16x256xf32>
    %c0_6 = arith.constant 0 : index
    %c0_7 = arith.constant 0 : index
    %7 = vector.load %arg4[%c0_6, %c0_7] : memref<16x1xf32, #tpu.memory_space<vmem>>, vector<16x1xf32>
    %8 = vector.broadcast %7 : vector<16x1xf32> to vector<16x256xf32>
    %9 = arith.addf %6, %8 : vector<16x256xf32>
    %cst_8 = arith.constant 0.000000e+00 : f32
    %cst_9 = arith.constant 6.000000e+00 : f32
    %10 = vector.broadcast %cst_8 : f32 to vector<16x256xf32>
    %11 = arith.maximumf %10, %9 : vector<16x256xf32>
    %12 = vector.broadcast %cst_9 : f32 to vector<16x256xf32>
    %13 = arith.minimumf %12, %11 : vector<16x256xf32>
    %cst_10 = arith.constant 0.000000e+00 : f32
    %14 = vector.broadcast %cst_10 : f32 to vector<16x256xf32>
    %c0_11 = arith.constant 0 : index
    %c0_12 = arith.constant 0 : index
    %15 = vector.load %arg5[%c0_11, %c0_12] : memref<16x9xf32, #tpu.memory_space<vmem>>, vector<16x1xf32>
    %c17_i32 = arith.constant 17 : i32
    %16 = tpu.dynamic_rotate %13 by %c17_i32 dim 1 : vector<16x256xf32>, i32 -> vector<16x256xf32>
    %17 = vector.broadcast %15 : vector<16x1xf32> to vector<16x256xf32>
    %18 = arith.mulf %16, %17 : vector<16x256xf32>
    %c0_13 = arith.constant 0 : index
    %c0_14 = arith.constant 0 : index
    %19 = vector.load %arg11[%c0_13, %c0_14] : memref<9x256xf32, #tpu.memory_space<vmem>>, vector<1x256xf32>
    %20 = vector.broadcast %19 : vector<1x256xf32> to vector<16x256xf32>
    %21 = arith.mulf %18, %20 : vector<16x256xf32>
    %22 = arith.addf %14, %21 : vector<16x256xf32>
    %c0_15 = arith.constant 0 : index
    %c1 = arith.constant 1 : index
    %23 = vector.load %arg5[%c0_15, %c1] : memref<16x9xf32, #tpu.memory_space<vmem>>, vector<16x1xf32>
    %c16_i32 = arith.constant 16 : i32
    %24 = tpu.dynamic_rotate %13 by %c16_i32 dim 1 : vector<16x256xf32>, i32 -> vector<16x256xf32>
    %25 = vector.broadcast %23 : vector<16x1xf32> to vector<16x256xf32>
    %26 = arith.mulf %24, %25 : vector<16x256xf32>
    %c1_16 = arith.constant 1 : index
    %c0_17 = arith.constant 0 : index
    %27 = vector.load %arg11[%c1_16, %c0_17] : memref<9x256xf32, #tpu.memory_space<vmem>>, vector<1x256xf32>
    %28 = vector.broadcast %27 : vector<1x256xf32> to vector<16x256xf32>
    %29 = arith.mulf %26, %28 : vector<16x256xf32>
    %30 = arith.addf %22, %29 : vector<16x256xf32>
    %c0_18 = arith.constant 0 : index
    %c2 = arith.constant 2 : index
    %31 = vector.load %arg5[%c0_18, %c2] : memref<16x9xf32, #tpu.memory_space<vmem>>, vector<16x1xf32>
    %c15_i32 = arith.constant 15 : i32
    %32 = tpu.dynamic_rotate %13 by %c15_i32 dim 1 : vector<16x256xf32>, i32 -> vector<16x256xf32>
    %33 = vector.broadcast %31 : vector<16x1xf32> to vector<16x256xf32>
    %34 = arith.mulf %32, %33 : vector<16x256xf32>
    %c2_19 = arith.constant 2 : index
    %c0_20 = arith.constant 0 : index
    %35 = vector.load %arg11[%c2_19, %c0_20] : memref<9x256xf32, #tpu.memory_space<vmem>>, vector<1x256xf32>
    %36 = vector.broadcast %35 : vector<1x256xf32> to vector<16x256xf32>
    %37 = arith.mulf %34, %36 : vector<16x256xf32>
    %38 = arith.addf %30, %37 : vector<16x256xf32>
    %c0_21 = arith.constant 0 : index
    %c3 = arith.constant 3 : index
    %39 = vector.load %arg5[%c0_21, %c3] : memref<16x9xf32, #tpu.memory_space<vmem>>, vector<16x1xf32>
    %c1_i32 = arith.constant 1 : i32
    %40 = tpu.dynamic_rotate %13 by %c1_i32 dim 1 : vector<16x256xf32>, i32 -> vector<16x256xf32>
    %41 = vector.broadcast %39 : vector<16x1xf32> to vector<16x256xf32>
    %42 = arith.mulf %40, %41 : vector<16x256xf32>
    %c3_22 = arith.constant 3 : index
    %c0_23 = arith.constant 0 : index
    %43 = vector.load %arg11[%c3_22, %c0_23] : memref<9x256xf32, #tpu.memory_space<vmem>>, vector<1x256xf32>
    %44 = vector.broadcast %43 : vector<1x256xf32> to vector<16x256xf32>
    %45 = arith.mulf %42, %44 : vector<16x256xf32>
    %46 = arith.addf %38, %45 : vector<16x256xf32>
    %c0_24 = arith.constant 0 : index
    %c4 = arith.constant 4 : index
    %47 = vector.load %arg5[%c0_24, %c4] : memref<16x9xf32, #tpu.memory_space<vmem>>, vector<16x1xf32>
    %48 = vector.broadcast %47 : vector<16x1xf32> to vector<16x256xf32>
    %49 = arith.mulf %13, %48 : vector<16x256xf32>
    %50 = arith.addf %46, %49 : vector<16x256xf32>
    %c0_25 = arith.constant 0 : index
    %c5 = arith.constant 5 : index
    %51 = vector.load %arg5[%c0_25, %c5] : memref<16x9xf32, #tpu.memory_space<vmem>>, vector<16x1xf32>
    %c255_i32 = arith.constant 255 : i32
    %52 = tpu.dynamic_rotate %13 by %c255_i32 dim 1 : vector<16x256xf32>, i32 -> vector<16x256xf32>
    %53 = vector.broadcast %51 : vector<16x1xf32> to vector<16x256xf32>
    %54 = arith.mulf %52, %53 : vector<16x256xf32>
    %c5_26 = arith.constant 5 : index
    %c0_27 = arith.constant 0 : index
    %55 = vector.load %arg11[%c5_26, %c0_27] : memref<9x256xf32, #tpu.memory_space<vmem>>, vector<1x256xf32>
    %56 = vector.broadcast %55 : vector<1x256xf32> to vector<16x256xf32>
    %57 = arith.mulf %54, %56 : vector<16x256xf32>
    %58 = arith.addf %50, %57 : vector<16x256xf32>
    %c0_28 = arith.constant 0 : index
    %c6 = arith.constant 6 : index
    %59 = vector.load %arg5[%c0_28, %c6] : memref<16x9xf32, #tpu.memory_space<vmem>>, vector<16x1xf32>
    %c241_i32 = arith.constant 241 : i32
    %60 = tpu.dynamic_rotate %13 by %c241_i32 dim 1 : vector<16x256xf32>, i32 -> vector<16x256xf32>
    %61 = vector.broadcast %59 : vector<16x1xf32> to vector<16x256xf32>
    %62 = arith.mulf %60, %61 : vector<16x256xf32>
    %c6_29 = arith.constant 6 : index
    %c0_30 = arith.constant 0 : index
    %63 = vector.load %arg11[%c6_29, %c0_30] : memref<9x256xf32, #tpu.memory_space<vmem>>, vector<1x256xf32>
    %64 = vector.broadcast %63 : vector<1x256xf32> to vector<16x256xf32>
    %65 = arith.mulf %62, %64 : vector<16x256xf32>
    %66 = arith.addf %58, %65 : vector<16x256xf32>
    %c0_31 = arith.constant 0 : index
    %c7 = arith.constant 7 : index
    %67 = vector.load %arg5[%c0_31, %c7] : memref<16x9xf32, #tpu.memory_space<vmem>>, vector<16x1xf32>
    %c240_i32 = arith.constant 240 : i32
    %68 = tpu.dynamic_rotate %13 by %c240_i32 dim 1 : vector<16x256xf32>, i32 -> vector<16x256xf32>
    %69 = vector.broadcast %67 : vector<16x1xf32> to vector<16x256xf32>
    %70 = arith.mulf %68, %69 : vector<16x256xf32>
    %c7_32 = arith.constant 7 : index
    %c0_33 = arith.constant 0 : index
    %71 = vector.load %arg11[%c7_32, %c0_33] : memref<9x256xf32, #tpu.memory_space<vmem>>, vector<1x256xf32>
    %72 = vector.broadcast %71 : vector<1x256xf32> to vector<16x256xf32>
    %73 = arith.mulf %70, %72 : vector<16x256xf32>
    %74 = arith.addf %66, %73 : vector<16x256xf32>
    %c0_34 = arith.constant 0 : index
    %c8 = arith.constant 8 : index
    %75 = vector.load %arg5[%c0_34, %c8] : memref<16x9xf32, #tpu.memory_space<vmem>>, vector<16x1xf32>
    %c239_i32 = arith.constant 239 : i32
    %76 = tpu.dynamic_rotate %13 by %c239_i32 dim 1 : vector<16x256xf32>, i32 -> vector<16x256xf32>
    %77 = vector.broadcast %75 : vector<16x1xf32> to vector<16x256xf32>
    %78 = arith.mulf %76, %77 : vector<16x256xf32>
    %c8_35 = arith.constant 8 : index
    %c0_36 = arith.constant 0 : index
    %79 = vector.load %arg11[%c8_35, %c0_36] : memref<9x256xf32, #tpu.memory_space<vmem>>, vector<1x256xf32>
    %80 = vector.broadcast %79 : vector<1x256xf32> to vector<16x256xf32>
    %81 = arith.mulf %78, %80 : vector<16x256xf32>
    %82 = arith.addf %74, %81 : vector<16x256xf32>
    %c0_37 = arith.constant 0 : index
    %c0_38 = arith.constant 0 : index
    %83 = vector.load %arg6[%c0_37, %c0_38] : memref<16x1xf32, #tpu.memory_space<vmem>>, vector<16x1xf32>
    %84 = vector.broadcast %83 : vector<16x1xf32> to vector<16x256xf32>
    %85 = arith.mulf %82, %84 : vector<16x256xf32>
    %c0_39 = arith.constant 0 : index
    %c0_40 = arith.constant 0 : index
    %86 = vector.load %arg7[%c0_39, %c0_40] : memref<16x1xf32, #tpu.memory_space<vmem>>, vector<16x1xf32>
    %87 = vector.broadcast %86 : vector<16x1xf32> to vector<16x256xf32>
    %88 = arith.addf %85, %87 : vector<16x256xf32>
    %cst_41 = arith.constant 0.000000e+00 : f32
    %cst_42 = arith.constant 6.000000e+00 : f32
    %89 = vector.broadcast %cst_41 : f32 to vector<16x256xf32>
    %90 = arith.maximumf %89, %88 : vector<16x256xf32>
    %91 = vector.broadcast %cst_42 : f32 to vector<16x256xf32>
    %92 = arith.minimumf %91, %90 : vector<16x256xf32>
    %c0_43 = arith.constant 0 : index
    %c0_44 = arith.constant 0 : index
    %93 = vector.load %arg8[%c0_43, %c0_44] : memref<4x16xf32, #tpu.memory_space<vmem>>, vector<4x16xf32>
    %cst_45 = arith.constant dense<0.000000e+00> : vector<4x256xf32>
    %94 = tpu.matmul %93, %92, %cst_45 {dimension_numbers = #tpu.dot_dimension_numbers<[1], [0], [0], [1], [0, 0, 1, 1], [], []>} : vector<4x16xf32>, vector<16x256xf32>, vector<4x256xf32> -> vector<4x256xf32>
    %c0_46 = arith.constant 0 : index
    %c0_47 = arith.constant 0 : index
    %95 = vector.load %arg9[%c0_46, %c0_47] : memref<4x1xf32, #tpu.memory_space<vmem>>, vector<4x1xf32>
    %96 = vector.broadcast %95 : vector<4x1xf32> to vector<4x256xf32>
    %97 = arith.mulf %94, %96 : vector<4x256xf32>
    %c0_48 = arith.constant 0 : index
    %c0_49 = arith.constant 0 : index
    %98 = vector.load %arg10[%c0_48, %c0_49] : memref<4x1xf32, #tpu.memory_space<vmem>>, vector<4x1xf32>
    %99 = vector.broadcast %98 : vector<4x1xf32> to vector<4x256xf32>
    %100 = arith.addf %97, %99 : vector<4x256xf32>
    %101 = arith.addf %1, %100 : vector<4x256xf32>
    %c0_50 = arith.constant 0 : index
    %c0_51 = arith.constant 0 : index
    %c0_52 = arith.constant 0 : index
    %102 = vector.load %arg12[%c0_50, %c0_51, %c0_52] : memref<1x4x256xf32, #tpu.memory_space<vmem>>, vector<1x4x256xf32>
    %103 = vector.shape_cast %102 : vector<1x4x256xf32> to vector<4x256xf32>
    %104 = vector.shape_cast %101 : vector<4x256xf32> to vector<1x4x256xf32>
    tpu.vector_store %arg12[%c0_50, %c0_51, %c0_52], %104 {strides = array<i32>} : memref<1x4x256xf32, #tpu.memory_space<vmem>>, vector<1x4x256xf32>,
    return
  }
  func.func @transform_0(%arg0: i32) -> (i32, i32, i32) {
    %c0_i32 = arith.constant 0 : i32
    %c0_i32_0 = arith.constant 0 : i32
    %c0_i32_1 = arith.constant 0 : i32
    return %arg0, %c0_i32, %c0_i32_0 : i32, i32, i32
  }
  func.func @transform_1(%arg0: i32) -> (i32, i32) {
    %c0_i32 = arith.constant 0 : i32
    %c0_i32_0 = arith.constant 0 : i32
    %c0_i32_1 = arith.constant 0 : i32
    return %c0_i32, %c0_i32_0 : i32, i32
  }
  func.func @transform_2(%arg0: i32) -> (i32, i32) {
    %c0_i32 = arith.constant 0 : i32
    %c0_i32_0 = arith.constant 0 : i32
    %c0_i32_1 = arith.constant 0 : i32
    return %c0_i32, %c0_i32_0 : i32, i32
  }
  func.func @transform_3(%arg0: i32) -> (i32, i32) {
    %c0_i32 = arith.constant 0 : i32
    %c0_i32_0 = arith.constant 0 : i32
    %c0_i32_1 = arith.constant 0 : i32
    return %c0_i32, %c0_i32_0 : i32, i32
  }
  func.func @transform_4(%arg0: i32) -> (i32, i32) {
    %c0_i32 = arith.constant 0 : i32
    %c0_i32_0 = arith.constant 0 : i32
    %c0_i32_1 = arith.constant 0 : i32
    return %c0_i32, %c0_i32_0 : i32, i32
  }
  func.func @transform_5(%arg0: i32) -> (i32, i32) {
    %c0_i32 = arith.constant 0 : i32
    %c0_i32_0 = arith.constant 0 : i32
    %c0_i32_1 = arith.constant 0 : i32
    return %c0_i32, %c0_i32_0 : i32, i32
  }
  func.func @transform_6(%arg0: i32) -> (i32, i32) {
    %c0_i32 = arith.constant 0 : i32
    %c0_i32_0 = arith.constant 0 : i32
    %c0_i32_1 = arith.constant 0 : i32
    return %c0_i32, %c0_i32_0 : i32, i32
  }
  func.func @transform_7(%arg0: i32) -> (i32, i32) {
    %c0_i32 = arith.constant 0 : i32
    %c0_i32_0 = arith.constant 0 : i32
    %c0_i32_1 = arith.constant 0 : i32
    return %c0_i32, %c0_i32_0 : i32, i32
  }
  func.func @transform_8(%arg0: i32) -> (i32, i32) {
    %c0_i32 = arith.constant 0 : i32
    %c0_i32_0 = arith.constant 0 : i32
    %c0_i32_1 = arith.constant 0 : i32
    return %c0_i32, %c0_i32_0 : i32, i32
  }
  func.func @transform_9(%arg0: i32) -> (i32, i32) {
    %c0_i32 = arith.constant 0 : i32
    %c0_i32_0 = arith.constant 0 : i32
    %c0_i32_1 = arith.constant 0 : i32
    return %c0_i32, %c0_i32_0 : i32, i32
  }
  func.func @transform_10(%arg0: i32) -> (i32, i32) {
    %c0_i32 = arith.constant 0 : i32
    %c0_i32_0 = arith.constant 0 : i32
    %c0_i32_1 = arith.constant 0 : i32
    return %c0_i32, %c0_i32_0 : i32, i32
  }
  func.func @transform_11(%arg0: i32) -> (i32, i32, i32) {
    %c0_i32 = arith.constant 0 : i32
    %c0_i32_0 = arith.constant 0 : i32
    %c0_i32_1 = arith.constant 0 : i32
    return %arg0, %c0_i32, %c0_i32_0 : i32, i32, i32
  }
}

</mosaic_0001>

<bundles_post_ra>
// kernel: mobilenet_v2_block.1
= control target key start
LH: loop header
LB: loop body
LE: loop exit
PB: predicated region body
PF: predicated region fallthrough
CT: control target
= control target key end

     0   :  { %s1264_s17 = smov 0   ;;  %s1643_s0 = inlined_call_operand.vmem [shape: f32[2,4,256], index: 0, kind: input, shape index: {}]   ;;  %s1644_s1 = inlined_call_operand.vmem [shape: f32[16,4], index: 1, kind: input, shape index: {}]   ;;  %s1645_s2 = inlined_call_operand.vmem [shape: f32[16,1], index: 2, kind: input, shape index: {}]   ;;  %s1646_s3 = inlined_call_operand.vmem [shape: f32[16,1], index: 3, kind: input, shape index: {}]   ;;  %s1647_s4 = inlined_call_operand.vmem [shape: f32[16,9], index: 4, kind: input, shape index: {}]   ;;  %s1648_s5 = inlined_call_operand.vmem [shape: f32[16,1], index: 5, kind: input, shape index: {}]   ;;  %s1649_s6 = inlined_call_operand.vmem [shape: f32[16,1], index: 6, kind: input, shape index: {}]   ;;  %s1650_s7 = inlined_call_operand.vmem [shape: f32[4,16], index: 7, kind: input, shape index: {}]   ;;  %s1651_s8 = inlined_call_operand.vmem [shape: f32[4,1], index: 8, kind: input, shape index: {}]   ;;  %s1652_s9 = inlined_call_operand.vmem [shape: f32[4,1], index: 9, kind: input, shape index: {}]   ;;  %s1653_s10 = inlined_call_operand.vmem [shape: f32[9,256], index: 10, kind: input, shape index: {}]   ;;  %s1654_s11 = inlined_call_operand.vmem [shape: f32[2,4,256], index: 11, kind: output, shape index: {}]  }
   0x1 LB: > { %s1103_s18 = sadd.s32 4294967295, %s1184_s17   ;;  %p1107_p0 = scmp.ge.s32.totalorder %s1184_s17, 1  ;;  %s1184_s17 = sphi %s1264_s17, %s21_s17  }
   0x2   : > { %p337_p1 = scmp.lt.s32.totalorder %s1184_s17, 3 }
   0x4   : > { %p338_p2 = pnand %p1107_p0, %p337_p1 }
   0x5   : > { %p377_p3 = scmp.lt.s32.totalorder (!%p338_p2), %s1103_s18, 1  ;;  %v1186_v0 = vmov (!%p338_p2), 0.0   ;;  %v497_v1 = vld [vmem:[%s1646_s3] sm:$0xff] (!%p338_p2)  ;;  %v1187_v2 = vmov (!%p338_p2), 0   ;;  %v498_v4 = vld [vmem:[%s1646_s3 + $0x8] sm:$0xff] (!%p338_p2)  ;;  %vm399_vm0 = vcmask (!%p338_p2), 1043456  }
   0x6   : > { %341 = sbr.rel (%p338_p2) target bundleno = 679 (0x2a7), region = 64  ;;  %468 = vmatprep.mubr.f32.mxu0 (!%p338_p2), %v1186_v0  ;;  %1019 = vmatprep.mubr.f32.mxu1 (!%p338_p2), %v1186_v0  ;;  %v481_v3 = vld [vmem:[%s1645_s2] sm:$0xff] (!%p338_p2)  ;;  %v482_v5 = vld [vmem:[%s1645_s2 + $0x8] sm:$0xff] (!%p338_p2)  ;;  %vm392_vm1 = vcmask (!%p338_p2), 31744   ;;  %v1188_v12 = vmov (!%p338_p2), 1   ;;  %v1189_v13 = vmov (!%p338_p2), 2  }
   0x7   : > { %1159 = vset.pattern.permute.xlu1 (!%p338_p2), %v1187_v2  ;;  %1158 = vset.pattern.permute.xlu0 (!%p338_p2), %v1187_v2  ;;  %v388_v8 = vld [vmem:[%s1644_s1] sm:$0xff] (!%p338_p2)  ;;  %v522_v9 = vld [vmem:[%s1647_s4 + $0x8] sm:$0xff] (!%p338_p2)  ;;  %v1190_v14 = vmov (!%p338_p2), 4   ;;  %v1191_v15 = vmov (!%p338_p2), 3   ;;  %v1192_v16 = vmov (!%p338_p2), 5   ;;  %v1193_v17 = vmov (!%p338_p2), 6  }
   0x8   : > { %501 = vperm.xlu1 (!%p338_p2), %1159, %v497_v1   ;;  %485 = vperm.xlu0 (!%p338_p2), %1158, %v481_v3   ;;  %v521_v10 = vld [vmem:[%s1647_s4] sm:$0xff] (!%p338_p2)  ;;  %v389_v11 = vld [vmem:[%s1644_s1 + $0x8] sm:$0xff] (!%p338_p2)  ;;  %v1194_v18 = vmov (!%p338_p2), 7   ;;  %v1195_v19 = vmov (!%p338_p2), 8   ;;  %s1196_s25 = smov (!%p338_p2), 1   ;;  %s1197_s26 = smov (!%p338_p2), 17  }
   0x9   : > { %v910_v20 = vld [vmem:[%s1648_s5] sm:$0xff] (!%p338_p2)  ;;  %s1198_s27 = smov (!%p338_p2), 127   ;;  %s1199_s28 = smov (!%p338_p2), 16   ;;  %v911_v58 = vld [vmem:[%s1648_s5 + $0x8] sm:$0xff] (!%p338_p2)  ;;  %vm951_vm10 = vcmask (!%p338_p2), 130048  }
   0xa   : > { %s1200_s29 = smov (!%p338_p2), 113   ;;  %s1202_s12 = smov (!%p338_p2), 112   ;;  %v1026_v59 = vld [vmem:[%s1651_s8] sm:$0xf] (!%p338_p2)  ;;  %v927_v61 = vld [vmem:[%s1649_s6 + $0x8] sm:$0xff] (!%p338_p2) }
   0xb   : > { %s1203_s13 = smov (!%p338_p2), 111   ;;  %v926_v60 = vld [vmem:[%s1649_s6] sm:$0xff] (!%p338_p2) }
   0xc   : > { %506 = vperm.xlu1 (!%p338_p2), %1159, %v498_v4   ;;  %490 = vperm.xlu0 (!%p338_p2), %1158, %v482_v5   ;;  %v1034_v62 = vld [vmem:[%s1652_s9] sm:$0xf] (!%p338_p2) }
   0xd   : > { %s1656_s18 = smov (!%p377_p3, %s1103_s18), 1 }
   0xe   : > { %s1126_s23 = sshll.u32 %s1656_s18, 3 }
   0xf   : > { %s381_s30 = scalar_lea.vmem %s1643_s0, %s1126_s23 }
  0x10   : > { %v1294_v6 = vld [vmem:[%s381_s30] sm:$0xff]  ;;  %545 = vperm.xlu1 %1159, %v522_v9   ;;  %1160 = vset.pattern.permute.xlu0 %v1188_v12  ;;  %s1201_s30 = smov 15  }
  0x11   : > { %v391_v7 = vcombine.high %v1294_v6, %v1294_v6  ;;  %586 = vperm.xlu0 %1160, %v521_v10  }
  0x13   : > { %1112 = vmatprep.subr.msk.mxu0 %vm399_vm0, %v391_v7 }
  0x14   : > { %1113 = vmatpush1.msk.msra.mxu0 %vm399_vm0, %v1294_v6  ;;  %1161 = vset.pattern.permute.xlu1 %v1188_v12 }
  0x15   : > { %1114 = vmatmul.mubr.msk.f32.vlgmr.msra.gmra.mrb[0].mxu0 %vm392_vm1, %v388_v8  ;;  %590 = vperm.xlu1 %1161, %v522_v9  }
  0x16   : > { %474 = vmatprep.mubr.f32.mxu0 %v1186_v0  ;;  %1163 = vset.pattern.permute.xlu0 %v1189_v13 }
  0x17   : > { %636 = vperm.xlu0 %1163, %v522_v9  }
  0x19   : > { %1115 = vmatmul.mubr.msk.f32.gmra.mrb[2].mxu0 %vm392_vm1, %v389_v11  ;;  %1162 = vset.pattern.permute.xlu1 %v1189_v13 }
  0x1a   : > { %632 = vperm.xlu1 %1162, %v521_v10  }
  0x1b   : > { %1165 = vset.pattern.permute.xlu0 %v1190_v14 }
  0x1c   : > { %711 = vperm.xlu0 %1165, %v521_v10  }
  0x1e   : > { %1164 = vset.pattern.permute.xlu1 %v1191_v15 }
  0x1f   : > { %678 = vperm.xlu1 %1164, %v521_v10  }
  0x20   : > { %1168 = vset.pattern.permute.xlu0 %v1192_v16 }
  0x21   : > { %744 = vperm.xlu0 %1168, %v522_v9  }
  0x23   : > { %682 = vperm.xlu1 %1164, %v522_v9  }
  0x25   : > { %1169 = vset.pattern.permute.xlu0 %v1193_v17 }
  0x26   : > { %786 = vperm.xlu0 %1169, %v521_v10  }
  0x27   : > { %1166 = vset.pattern.permute.xlu1 %v1190_v14  ;;  %v531_v14 = vlaneseq }
  0x28   : > { %715 = vperm.xlu1 %1166, %v522_v9  }
  0x2a   : > { %1172 = vset.pattern.permute.xlu0 %v1194_v18 }
  0x2b   : > { %836 = vperm.xlu0 %1172, %v522_v9  }
  0x2c   : > { %1167 = vset.pattern.permute.xlu1 %v1192_v16 }
  0x2d   : > { %740 = vperm.xlu1 %1167, %v521_v10  }
  0x2f   : > { %1173 = vset.pattern.permute.xlu0 %v1195_v19 }
  0x30   : > { %878 = vperm.xlu0 %1173, %v521_v10  }
  0x31   : > { %1170 = vset.pattern.permute.xlu1 %v1193_v17  ;;  %v555_v17 = vshrl.u32 %v531_v14, 7 }
  0x32   : > { %790 = vperm.xlu1 %1170, %v522_v9  }
  0x34   : > { %1174 = vset.pattern.permute.xlu0 %v1187_v2 }
  0x35   : > { %540 = vperm.xlu0 %1174, %v521_v10  }
  0x36   : > { %1171 = vset.pattern.permute.xlu1 %v1194_v18  ;;  %v1395_v18 = vand.u32 127, %v531_v14 }
  0x37   : > { %832 = vperm.xlu1 %1171, %v521_v10  }
  0x38   : > { %vm580_vm2 = vcmp.lt.s32.totalorder %v1395_v18, 16  ;;  %vm533_vm3 = vcmp.lt.s32.totalorder %v1395_v18, 17  ;;  %vm626_vm4 = vcmp.lt.s32.totalorder %v1395_v18, 15  ;;  %vm780_vm5 = vcmp.lt.s32.totalorder %v1395_v18, 113 }
  0x39   : > { %vm826_vm6 = vcmp.lt.s32.totalorder %v1395_v18, 112  ;;  %vm672_vm7 = vcmp.lt.s32.totalorder %v1395_v18, 1  ;;  %vm872_vm8 = vcmp.lt.s32.totalorder %v1395_v18, 111  ;;  %vm734_vm9 = vcmp.lt.s32.totalorder %v1395_v18, 127 }
  0x3b   : > { %1175 = vset.pattern.permute.xlu1 %v1195_v19 }
  0x3c   : > { %882 = vperm.xlu1 %1175, %v522_v9  }
  0x40   : > { %1176 = vset.pattern.permute.xlu1 %v1187_v2 }
  0x41   : > { %914 = vperm.xlu1 %1176, %v910_v20  }
  0x87   : > { %v502_v21 = vpop.permute.xlu1 %501  ;;  %v486_v24 = vpop.permute.xlu0 %485 }
  0x8b   : > { %v507_v22 = vpop.permute.xlu1 %506  ;;  %v491_v26 = vpop.permute.xlu0 %490 }
  0x8f   : > { %v1316_v23 = vpop.permute.xlu1 %545 }
  0x90   : > { %v1322_v28 = vpop.permute.xlu0 %586 }
  0x94   : > { %v1318_v25 = vpop.permute.xlu1 %590 }
  0x96   : > { %v1326_v31 = vpop.permute.xlu0 %636 }
  0x99   : > { %v1320_v27 = vpop.permute.xlu1 %632 }
  0x9b   : > { %v712_v44 = vpop.permute.xlu0 %711 }
  0x9e   : > { %v1324_v29 = vpop.permute.xlu1 %678 }
  0xa0   : > { %v1375_v0 = vpop.permute.xlu0 %744 }
  0xa2   : > { %v1328_v38 = vpop.permute.xlu1 %682 }
  0xa5   : > { %v1379_v2 = vpop.permute.xlu0 %786 }
  0xa7   : > { %v716_v53 = vpop.permute.xlu1 %715 }
  0xaa   : > { %v1383_v4 = vpop.permute.xlu0 %836 }
  0xac   : > { %v1373_v63 = vpop.permute.xlu1 %740 }
  0xaf   : > { %v1387_v7 = vpop.permute.xlu0 %878 }
  0xb1   : > { %v1377_v1 = vpop.permute.xlu1 %790 }
  0xb4   : > { %v541_v9 = vpop.permute.xlu0 %540 }
  0xb6   : > { %v1381_v3 = vpop.permute.xlu1 %832 }
  0xbb   : > { %v1385_v5 = vpop.permute.xlu1 %882 }
  0xc0   : > { %v1389_v8 = vpop.permute.xlu1 %914 }
  0xe8   : > { %v470_v30 = vpop.f32.mrb[0].mxu0 }
  0xe9   : > { %v493_v32 = vmul.f32 %v486_v24, %v470_v30  ;;  %v472_v33 = vpop.f32.mrb[1].mxu0 }
  0xea   : > { %v494_v34 = vmul.f32 %v486_v24, %v472_v33  ;;  %v552_v24 = vld [vmem:[%s1653_s10] ss:$8 sm:$0x3] }
  0xeb   : > { %v509_v35 = vadd.f32 %v502_v21, %v493_v32 }
  0xec   : > { %v510_v36 = vadd.f32 %v502_v21, %v494_v34  ;;  %v476_v37 = vpop.f32.mrb[2].mxu0  ;;  %v1399_v21 = vsub.s32 0, %v555_v17 }
  0xed   : > { %v513_v39 = vmax.f32 %v509_v35, 0.0  ;;  %v495_v40 = vmul.f32 %v491_v26, %v476_v37  ;;  %v478_v41 = vpop.f32.mrb[3].mxu0  ;;  %v1120_v37 = vld [vmem:[%s1653_s10 + $0x6] ss:$8 sm:$0x3] }
  0xee   : > { %v514_v42 = vmax.f32 %v510_v36, 0.0  ;;  %v496_v43 = vmul.f32 %v491_v26, %v478_v41  ;;  %v1116_v26 = vld [vmem:[%s1653_s10 + $0x1] ss:$8 sm:$0x3]  ;;  %v1414_v33 = vrot.slane %v552_v24, %v1399_v21 }
  0xef   : > { %v517_v45 = vmin.f32 %v513_v39, 6.0  ;;  %v511_v46 = vadd.f32 %v507_v22, %v495_v40  ;;  %v1117_v39 = vld [vmem:[%s1653_s10 + $0x2] ss:$8 sm:$0x3] }
  0xf0   : > { %v518_v47 = vmin.f32 %v514_v42, 6.0  ;;  %v512_v48 = vadd.f32 %v507_v22, %v496_v43  ;;  %v1401_v22 = vsub.s32 1, %v555_v17  ;;  %v1434_v42 = vrot.slane %v1116_v26, %v1399_v21 }
  0xf1   : > { %v515_v49 = vmax.f32 %v511_v46, 0.0  ;;  %v1330_v50 = vmul.f32 %v712_v44, %v517_v45  ;;  %664 = vrot.lane.b32.xlu1 %v517_v45, %s1196_s25  ;;  %523 = vrot.lane.b32.xlu0 %v517_v45, %s1197_s26  ;;  %v1121_v46 = vld [vmem:[%s1653_s10 + $0x7] ss:$8 sm:$0x3] }
  0xf2   : > { %v516_v51 = vmax.f32 %v512_v48, 0.0  ;;  %v1334_v52 = vmul.f32 %v712_v44, %v518_v47  ;;  %v1417_v34 = vrot.slane %v552_v24, %v1401_v22  ;;  %v1438_v43 = vrot.slane %v1116_v26, %v1401_v22 }
  0xf3   : > { %v519_v54 = vmin.f32 %v515_v49, 6.0  ;;  %v1450_v48 = vrot.slane %v1120_v37, %v1401_v22 }
  0xf4   : > { %v520_v55 = vmin.f32 %v516_v51, 6.0  ;;  %v1453_v51 = vrot.slane %v1117_v39, %v1399_v21 }
  0xf5   : > { %v1336_v56 = vmul.f32 %v716_v53, %v519_v54  ;;  %726 = vrot.lane.b32.xlu1 %v517_v45, %s1198_s27  ;;  %572 = vrot.lane.b32.xlu0 %v517_v45, %s1199_s28 }
  0xf6   : > { %v1340_v57 = vmul.f32 %v716_v53, %v520_v55  ;;  %v1456_v53 = vrot.slane %v1117_v39, %v1401_v22 }
  0xf9   : > { %772 = vrot.lane.b32.xlu1 %v517_v45, %s1200_s29  ;;  %618 = vrot.lane.b32.xlu0 %v517_v45, %s1201_s30 }
  0xfd   : > { %818 = vrot.lane.b32.xlu1 %v517_v45, %s1202_s12  ;;  %527 = vrot.lane.b32.xlu0 %v518_v47, %s1197_s26 }
 0x101   : > { %864 = vrot.lane.b32.xlu1 %v517_v45, %s1203_s13  ;;  %576 = vrot.lane.b32.xlu0 %v518_v47, %s1199_s28 }
 0x105   : > { %776 = vrot.lane.b32.xlu1 %v518_v47, %s1200_s29  ;;  %622 = vrot.lane.b32.xlu0 %v518_v47, %s1201_s30 }
 0x109   : > { %822 = vrot.lane.b32.xlu1 %v518_v47, %s1202_s12  ;;  %668 = vrot.lane.b32.xlu0 %v518_v47, %s1196_s25 }
 0x10d   : > { %868 = vrot.lane.b32.xlu1 %v518_v47, %s1203_s13  ;;  %730 = vrot.lane.b32.xlu0 %v518_v47, %s1198_s27  ;;  %v1447_v47 = vrot.slane %v1120_v37, %v1399_v21 }
 0x111   : > { %774 = vrot.lane.b32.xlu0 %v519_v54, %s1200_s29  ;;  %525 = vrot.lane.b32.xlu1 %v519_v54, %s1197_s26 }
 0x115   : > { %820 = vrot.lane.b32.xlu0 %v519_v54, %s1202_s12  ;;  %574 = vrot.lane.b32.xlu1 %v519_v54, %s1199_s28 }
 0x119   : > { %866 = vrot.lane.b32.xlu0 %v519_v54, %s1203_s13  ;;  %620 = vrot.lane.b32.xlu1 %v519_v54, %s1201_s30 }
 0x11d   : > { %666 = vrot.lane.b32.xlu1 %v519_v54, %s1196_s25  ;;  %778 = vrot.lane.b32.xlu0 %v520_v55, %s1200_s29 }
 0x121   : > { %728 = vrot.lane.b32.xlu1 %v519_v54, %s1198_s27  ;;  %824 = vrot.lane.b32.xlu0 %v520_v55, %s1202_s12  ;;  %s386_s12 = scalar_lea.vmem %s1654_s11, %s1126_s23 }
 0x125   : > { %870 = vrot.lane.b32.xlu0 %v520_v55, %s1203_s13  ;;  %529 = vrot.lane.b32.xlu1 %v520_v55, %s1197_s26 }
 0x129   : > { %919 = vperm.xlu0 %1174, %v911_v58   ;;  %578 = vrot.lane.b32.xlu1 %v520_v55, %s1199_s28 }
 0x12d   : > { %1029 = vperm.xlu0 %1174, %v1026_v59   ;;  %624 = vrot.lane.b32.xlu1 %v520_v55, %s1201_s30 }
 0x131   : > { %670 = vrot.lane.b32.xlu1 %v520_v55, %s1196_s25 }
 0x135   : > { %732 = vrot.lane.b32.xlu1 %v520_v55, %s1198_s27 }
 0x139   : > { %930 = vperm.xlu1 %1176, %v926_v60   ;;  %v1118_v60 = vld [vmem:[%s1653_s10 + $0x3] ss:$8 sm:$0x3] }
 0x13a   : > { %v1478_v17 = vrot.slane %v1118_v60, %v1399_v21 }
 0x13d   : > { %935 = vperm.xlu1 %1176, %v927_v61   ;;  %v1467_v61 = vrot.slane %v1121_v46, %v1399_v21 }
 0x141   : > { %1037 = vperm.xlu1 %1176, %v1034_v62   ;;  %v1470_v62 = vrot.slane %v1121_v46, %v1401_v22 }
 0x163   : > { %v1391_v10 = vpop.permute.xlu1 %664  ;;  %v524_v11 = vpop.permute.xlu0 %523 }
 0x167   : > { %v1393_v12 = vpop.permute.xlu1 %726  ;;  %v573_v13 = vpop.permute.xlu0 %572 }
 0x16b   : > { %v773_v15 = vpop.permute.xlu1 %772  ;;  %v619_v16 = vpop.permute.xlu0 %618 }
 0x16f   : > { %v1397_v19 = vpop.permute.xlu1 %818  ;;  %v528_v20 = vpop.permute.xlu0 %527 }
 0x170   : > { %v534_v40 = vsel %vm533_vm3, %v524_v11, %v528_v20  ;;  %v536_v41 = vsel %vm533_vm3, %v528_v20, %v524_v11  ;;  %v1481_v20 = vrot.slane %v1118_v60, %v1401_v22 }
 0x171   : > { %v548_v54 = vmul.f32 %v541_v9, %v536_v41  ;;  %v549_v55 = vmul.f32 %v541_v9, %v534_v40 }
 0x173   : > { %v1411_v30 = vpop.permute.xlu1 %864  ;;  %v577_v32 = vpop.permute.xlu0 %576  ;;  %v564_v26 = vmul.f32 %v1414_v33, %v548_v54 }
 0x174   : > { %v581_v35 = vsel %vm580_vm2, %v573_v13, %v577_v32  ;;  %v583_v36 = vsel %vm580_vm2, %v577_v32, %v573_v13  ;;  %v565_v32 = vmul.f32 %v1417_v34, %v549_v55 }
 0x175   : > { %v593_v44 = vmul.f32 %v1322_v28, %v583_v36  ;;  %v594_v45 = vmul.f32 %v1322_v28, %v581_v35  ;;  %v1119_v36 = vld [vmem:[%s1653_s10 + $0x5] ss:$8 sm:$0x3] }
 0x176   : > { %v1511_v55 = vrot.slane %v1119_v36, %v1399_v21 }
 0x177   : > { %v777_v49 = vpop.permute.xlu1 %776  ;;  %v623_v28 = vpop.permute.xlu0 %622  ;;  %v610_v9 = vmul.f32 %v1434_v42, %v593_v44  ;;  %v611_v11 = vmul.f32 %v1438_v43, %v594_v45 }
 0x178   : > { %v627_v58 = vsel %vm626_vm4, %v619_v16, %v623_v28  ;;  %v629_v59 = vsel %vm626_vm4, %v623_v28, %v619_v16  ;;  %v781_v37 = vsel %vm780_vm5, %v773_v15, %v777_v49  ;;  %v783_v39 = vsel %vm780_vm5, %v777_v49, %v773_v15 }
 0x179   : > { %v639_v13 = vmul.f32 %v1320_v27, %v629_v59  ;;  %v640_v14 = vmul.f32 %v1320_v27, %v627_v58  ;;  %v614_v44 = vadd.f32 %v610_v9, %v564_v26  ;;  %v615_v45 = vadd.f32 %v611_v11, %v565_v32  ;;  %v1122_v26 = vld [vmem:[%s1653_s10 + $0x10] ss:$8 sm:$0x3] }
 0x17a   : > { %v793_v11 = vmul.f32 %v1379_v2, %v781_v37 }
 0x17b   : > { %v823_v16 = vpop.permute.xlu1 %822  ;;  %v669_v24 = vpop.permute.xlu0 %668  ;;  %v656_v35 = vmul.f32 %v1453_v51, %v639_v13  ;;  %v657_v27 = vmul.f32 %v1456_v53, %v640_v14  ;;  %v794_v13 = vmul.f32 %v1379_v2, %v783_v39 }
 0x17c   : > { %v673_v40 = vsel %vm672_vm7, %v1391_v10, %v669_v24  ;;  %v675_v41 = vsel %vm672_vm7, %v669_v24, %v1391_v10  ;;  %v827_v54 = vsel %vm826_vm6, %v1397_v19, %v823_v16  ;;  %v829_v15 = vsel %vm826_vm6, %v823_v16, %v1397_v19 }
 0x17d   : > { %v685_v46 = vmul.f32 %v1324_v29, %v675_v41  ;;  %v686_v28 = vmul.f32 %v1324_v29, %v673_v40  ;;  %v1514_v10 = vrot.slane %v1119_v36, %v1401_v22  ;;  %v660_v59 = vadd.f32 %v656_v35, %v614_v44 }
 0x17e   : > { %v661_v60 = vadd.f32 %v657_v27, %v615_v45  ;;  %v839_v2 = vmul.f32 %v1381_v3, %v827_v54  ;;  %v840_v27 = vmul.f32 %v1381_v3, %v829_v15  ;;  %v810_v44 = vmul.f32 %v1447_v47, %v793_v11 }
 0x17f   : > { %v869_v49 = vpop.permute.xlu1 %868  ;;  %v731_v58 = vpop.permute.xlu0 %730  ;;  %v702_v29 = vmul.f32 %v1478_v17, %v685_v46  ;;  %v703_v9 = vmul.f32 %v1481_v20, %v686_v28  ;;  %v811_v3 = vmul.f32 %v1450_v48, %v794_v13  ;;  %v1546_v45 = vrot.slane %v1122_v26, %v1399_v21 }
 0x180   : > { %v735_v19 = vsel %vm734_vm9, %v1393_v12, %v731_v58  ;;  %v737_v14 = vsel %vm734_vm9, %v731_v58, %v1393_v12  ;;  %v873_v36 = vsel %vm872_vm8, %v1411_v30, %v869_v49  ;;  %v875_v12 = vsel %vm872_vm8, %v869_v49, %v1411_v30 }
 0x181   : > { %v706_v16 = vadd.f32 %v702_v29, %v660_v59  ;;  %v707_v24 = vadd.f32 %v703_v9, %v661_v60  ;;  %v747_v32 = vmul.f32 %v1373_v63, %v735_v19  ;;  %v748_v35 = vmul.f32 %v1373_v63, %v737_v14 }
 0x182   : > { %v1549_v46 = vrot.slane %v1122_v26, %v1401_v22  ;;  %v885_v30 = vmul.f32 %v1387_v7, %v873_v36  ;;  %v856_v15 = vmul.f32 %v1467_v61, %v839_v2  ;;  %v857_v49 = vmul.f32 %v1470_v62, %v840_v27 }
 0x183   : > { %v526_v37 = vpop.permute.xlu1 %525  ;;  %v722_v39 = vadd.f32 %v1330_v50, %v706_v16  ;;  %v723_v40 = vadd.f32 %v1334_v52, %v707_v24  ;;  %v764_v41 = vmul.f32 %v1511_v55, %v747_v32  ;;  %v765_v63 = vmul.f32 %v1514_v10, %v748_v35  ;;  %v775_v9 = vpop.permute.xlu0 %774 }
 0x184   : > { %v886_v50 = vmul.f32 %v1387_v7, %v875_v12  ;;  %v902_v60 = vmul.f32 %v1546_v45, %v885_v30 }
 0x185   : > { %v768_v28 = vadd.f32 %v764_v41, %v722_v39  ;;  %v769_v52 = vadd.f32 %v765_v63, %v723_v40 }
 0x186   : > { %v903_v21 = vmul.f32 %v1549_v46, %v886_v50 }
 0x187   : > { %v575_v54 = vpop.permute.xlu1 %574  ;;  %v814_v58 = vadd.f32 %v810_v44, %v768_v28  ;;  %v815_v59 = vadd.f32 %v811_v3, %v769_v52  ;;  %v821_v24 = vpop.permute.xlu0 %820 }
 0x189   : > { %v860_v29 = vadd.f32 %v856_v15, %v814_v58  ;;  %v861_v22 = vadd.f32 %v857_v49, %v815_v59 }
 0x18b   : > { %v621_v11 = vpop.permute.xlu1 %620  ;;  %v906_v13 = vadd.f32 %v902_v60, %v860_v29  ;;  %v907_v19 = vadd.f32 %v903_v21, %v861_v22  ;;  %v867_v32 = vpop.permute.xlu0 %866 }
 0x18d   : > { %v1558_v7 = vmul.f32 %v1389_v8, %v906_v13  ;;  %v1561_v14 = vmul.f32 %v1389_v8, %v907_v19 }
 0x18f   : > { %v667_v16 = vpop.permute.xlu1 %666  ;;  %v779_v8 = vpop.permute.xlu0 %778 }
 0x190   : > { %v782_v60 = vsel %vm780_vm5, %v775_v9, %v779_v8 }
 0x191   : > { %v795_v19 = vmul.f32 %v1377_v1, %v782_v60 }
 0x193   : > { %v729_v26 = vpop.permute.xlu1 %728 }
 0x197   : > { %v530_v35 = vpop.permute.xlu1 %529 }
 0x198   : > { %v535_v27 = vsel %vm533_vm3, %v526_v37, %v530_v35  ;;  %v537_v36 = vsel %vm533_vm3, %v530_v35, %v526_v37 }
 0x199   : > { %v550_v63 = vmul.f32 %v1316_v23, %v537_v36  ;;  %v551_v44 = vmul.f32 %v1316_v23, %v535_v27 }
 0x19b   : > { %v579_v2 = vpop.permute.xlu1 %578  ;;  %v566_v15 = vmul.f32 %v1414_v33, %v550_v63  ;;  %v567_v23 = vmul.f32 %v1417_v34, %v551_v44 }
 0x19c   : > { %v582_v12 = vsel %vm580_vm2, %v575_v54, %v579_v2  ;;  %v584_v39 = vsel %vm580_vm2, %v579_v2, %v575_v54 }
 0x19d   : > { %v595_v40 = vmul.f32 %v1318_v25, %v584_v39  ;;  %v596_v41 = vmul.f32 %v1318_v25, %v582_v12  ;;  %v825_v25 = vpop.permute.xlu0 %824 }
 0x19f   : > { %v625_v3 = vpop.permute.xlu1 %624  ;;  %v612_v50 = vmul.f32 %v1434_v42, %v595_v40  ;;  %v613_v28 = vmul.f32 %v1438_v43, %v596_v41  ;;  %v784_v42 = vsel %vm780_vm5, %v779_v8, %v775_v9  ;;  %v812_v41 = vmul.f32 %v1447_v47, %v795_v19 }
 0x1a0   : > { %v628_v30 = vsel %vm626_vm4, %v621_v11, %v625_v3  ;;  %v630_v37 = vsel %vm626_vm4, %v625_v3, %v621_v11 }
 0x1a1   : > { %v641_v52 = vmul.f32 %v1326_v31, %v630_v37  ;;  %v642_v54 = vmul.f32 %v1326_v31, %v628_v30  ;;  %v616_v33 = vadd.f32 %v612_v50, %v566_v15  ;;  %v617_v21 = vadd.f32 %v613_v28, %v567_v23  ;;  %v871_v39 = vpop.permute.xlu0 %870 }
 0x1a3   : > { %v658_v49 = vmul.f32 %v1453_v51, %v641_v52  ;;  %v659_v58 = vmul.f32 %v1456_v53, %v642_v54  ;;  %v671_v59 = vpop.permute.xlu1 %670  ;;  %v828_v53 = vsel %vm826_vm6, %v821_v24, %v825_v25 }
 0x1a4   : > { %v674_v43 = vsel %vm672_vm7, %v667_v16, %v671_v59  ;;  %v676_v31 = vsel %vm672_vm7, %v671_v59, %v667_v16  ;;  %v796_v16 = vmul.f32 %v1377_v1, %v784_v42 }
 0x1a5   : > { %v687_v34 = vmul.f32 %v1328_v38, %v676_v31  ;;  %v688_v51 = vmul.f32 %v1328_v38, %v674_v43  ;;  %v662_v29 = vadd.f32 %v658_v49, %v616_v33  ;;  %v663_v22 = vadd.f32 %v659_v58, %v617_v21 }
 0x1a6   : > { %v813_v63 = vmul.f32 %v1450_v48, %v796_v16 }
 0x1a7   : > { %v704_v11 = vmul.f32 %v1478_v17, %v687_v34  ;;  %v705_v9 = vmul.f32 %v1481_v20, %v688_v51  ;;  %v733_v13 = vpop.permute.xlu1 %732  ;;  %v830_v17 = vsel %vm826_vm6, %v825_v25, %v821_v24  ;;  %v841_v20 = vmul.f32 %v1383_v4, %v828_v53 }
 0x1a8   : > { %v736_v35 = vsel %vm734_vm9, %v729_v26, %v733_v13  ;;  %v738_v38 = vsel %vm734_vm9, %v733_v13, %v729_v26  ;;  %v874_v24 = vsel %vm872_vm8, %v867_v32, %v871_v39  ;;  %v920_v25 = vpop.permute.xlu0 %919 }
 0x1a9   : > { %v708_v2 = vadd.f32 %v704_v11, %v662_v29  ;;  %v709_v27 = vadd.f32 %v705_v9, %v663_v22  ;;  %v749_v36 = vmul.f32 %v1375_v0, %v736_v35  ;;  %v750_v12 = vmul.f32 %v1375_v0, %v738_v38 }
 0x1aa   : > { %v842_v0 = vmul.f32 %v1383_v4, %v830_v17  ;;  %v887_v47 = vmul.f32 %v1385_v5, %v874_v24 }
 0x1ab   : > { %v724_v1 = vadd.f32 %v1336_v56, %v708_v2  ;;  %v725_v8 = vadd.f32 %v1340_v57, %v709_v27  ;;  %v766_v40 = vmul.f32 %v1511_v55, %v749_v36  ;;  %v767_v26 = vmul.f32 %v1514_v10, %v750_v12 }
 0x1ac   : > { %v876_v56 = vsel %vm872_vm8, %v871_v39, %v867_v32  ;;  %v858_v57 = vmul.f32 %v1467_v61, %v841_v20  ;;  %v859_v10 = vmul.f32 %v1470_v62, %v842_v0  ;;  %v904_v50 = vmul.f32 %v1546_v45, %v887_v47 }
 0x1ad   : > { %v770_v44 = vadd.f32 %v766_v40, %v724_v1  ;;  %v771_v3 = vadd.f32 %v767_v26, %v725_v8  ;;  %v888_v48 = vmul.f32 %v1385_v5, %v876_v56 }
 0x1af   : > { %v816_v30 = vadd.f32 %v812_v41, %v770_v44  ;;  %v817_v55 = vadd.f32 %v813_v63, %v771_v3  ;;  %v905_v28 = vmul.f32 %v1549_v46, %v888_v48 }
 0x1b1   : > { %v862_v37 = vadd.f32 %v858_v57, %v816_v30  ;;  %v863_v4 = vadd.f32 %v859_v10, %v817_v55 }
 0x1b3   : > { %v908_v52 = vadd.f32 %v904_v50, %v862_v37  ;;  %v909_v54 = vadd.f32 %v905_v28, %v863_v4 }
 0x1b5   : > { %v924_v15 = vmul.f32 %v920_v25, %v908_v52  ;;  %v925_v62 = vmul.f32 %v920_v25, %v909_v54 }
 0x1b8   : > { %v931_v18 = vpop.permute.xlu1 %930 }
 0x1b9   : > { %v938_v32 = vadd.f32 %v931_v18, %v1558_v7  ;;  %v939_v61 = vadd.f32 %v931_v18, %v1561_v14  ;;  %v950_v7 = vld [vmem:[%s1650_s7] sm:$0xf]  ;;  %v1030_v14 = vpop.permute.xlu0 %1029 }
 0x1bb   : > { %v942_v49 = vmax.f32 %v938_v32, 0.0  ;;  %v943_v58 = vmax.f32 %v939_v61, 0.0 }
 0x1bc   : > { %v936_v23 = vpop.permute.xlu1 %935 }
 0x1bd   : > { %v940_v5 = vadd.f32 %v936_v23, %v924_v15  ;;  %v941_v59 = vadd.f32 %v936_v23, %v925_v62  ;;  %v946_v45 = vmin.f32 %v942_v49, 6.0  ;;  %v947_v46 = vmin.f32 %v943_v58, 6.0 }
 0x1bf   : > { %v944_v60 = vmax.f32 %v940_v5, 0.0  ;;  %v945_v42 = vmax.f32 %v941_v59, 0.0 }
 0x1c0   : > { %v1038_v29 = vpop.permute.xlu1 %1037 }
 0x1c1   : > { %v948_v43 = vmin.f32 %v944_v60, 6.0  ;;  %v949_v31 = vmin.f32 %v945_v42, 6.0 }
 0x1c3   : > { %v1128_v33 = vpack.c.bf16 %v949_v31, %v947_v46  ;;  %v1130_v21 = vpack.c.bf16 %v948_v43, %v946_v45 }
 0x1c5   : > { %1129 = vmatprep.subr.bf16.mxu1 %v1128_v33 }
 0x1c6   : > { %1131 = vmatpush1.bf16.msra.mxu1 %v1130_v21 }
 0x1c9   : > { %1123 = vmatmul.mubr.msk.f32.vlgmr.msra.gmra.mrb[0].mxu1 %vm951_vm10, %v950_v7 }
 0x29c   : > { %v1021_v34 = vpop.f32.mrb[0].mxu1 }
 0x29d   : > { %v1032_v51 = vmul.f32 %v1030_v14, %v1021_v34  ;;  %v1023_v53 = vpop.f32.mrb[1].mxu1 }
 0x29e   : > { %v1033_v22 = vmul.f32 %v1030_v14, %v1023_v53 }
 0x29f   : > { %v1040_v11 = vadd.f32 %v1038_v29, %v1032_v51 }
 0x2a0   : > { %v1041_v9 = vadd.f32 %v1038_v29, %v1033_v22 }
 0x2a2   : > { %v1044_v13 = vcombine.low %v1040_v11, %v1041_v9 }
 0x2a4   : > { %v1046_v19 = vadd.f32 %v1044_v13, %v1294_v6 }
 0x2a6   : > { %1047 = vst [vmem:[%s386_s12] sm:$0xff] %v1046_v19 }
 0x2a7 PF: > { %s21_s17 = sadd.s32 1, %s1184_s17  }
 0x2a8   : > { %p18_p4 = scmp.ge.s32.totalorder %s21_s17, 4  }
 0x2aa   :  { %20 = sbr.rel (!%p18_p4) target bundleno = 1 (0x1), region = 101 }

</bundles_post_ra>
